<compile_context>
chip_gen: v7x
topology: tpu7x:2x2x1
jax: 0.10.0
libtpu: 0.0.40
codegen_flags: <defaults>
</compile_context>

<pallas_src>
import functools
import math

import jax
import jax.numpy as jnp
from jax.experimental import pallas as pl
from jax.experimental.pallas import tpu as pltpu

# ----------------------------------------------------------------------------
# EfficientNetV2-S architecture config (torchvision):
#   (block_type, expand_ratio, kernel, stride, in_ch, out_ch, num_layers)
CFG = [
    ("fused", 1, 3, 1, 24, 24, 2),
    ("fused", 4, 3, 2, 24, 48, 4),
    ("fused", 4, 3, 2, 48, 64, 4),
    ("mb",    4, 3, 2, 64, 128, 6),
    ("mb",    6, 3, 1, 128, 160, 9),
    ("mb",    6, 3, 2, 160, 256, 15),
]
STEM_OUT = 24
HEAD_OUT = 1280
NUM_CLASSES = 5
BN_EPS = 1e-3  # efficientnet_v2 uses BatchNorm2d(eps=1e-3)


def _pick_vmem_limit():
    """Raise the scoped-VMEM limit where the chip allows it (v5e/v6e: 128 MiB physical),
    stay conservative on v7x (64 MiB physical)."""
    try:
        info = pltpu.get_tpu_info()
        cap = getattr(info, "vmem_capacity_bytes", None)
        if cap:
            return int(max(32 << 20, min(cap * 3 // 4, 100 << 20)))
    except Exception:
        pass
    return 32 << 20


VMEM_LIMIT = _pick_vmem_limit()
VMEM_BUDGET = max(8 << 20, VMEM_LIMIT // 4)   # budget used to pick row tiles


# ----------------------------------------------------------------------------
# small helpers

def _round_up(x, m):
    return (x + m - 1) // m * m


def _choose_tm(m, per_row_bytes):
    """Pick a row tile TM (multiple of 8, <=512) so per-step VMEM stays in budget.
    Prefers TM == round_up(m, 8) so no (or minimal) row padding is needed."""
    m8 = _round_up(max(m, 1), 8)
    tm = min(512, m8, max(8, VMEM_BUDGET // max(per_row_bytes, 1)))
    tm = max(8, (tm // 8) * 8)
    mp = _round_up(m, tm)
    return mp, tm


def _apply_act(y, act):
    # EUP approx reciprocal for the sigmoid denominator (frees VALU slots); f32 epilogue.
    if act == "silu":
        return y * pl.reciprocal(1.0 + jnp.exp(-y), approx=True)
    if act == "sigmoid":
        return pl.reciprocal(1.0 + jnp.exp(-y), approx=True)
    return y


# ----------------------------------------------------------------------------
# Pallas kernels (cached per unique shape signature)

@functools.lru_cache(maxsize=None)
def _conv_matmul_call(nb, mp, tm, kdim, nout, tn, act, has_gate, has_res, out_dtype):
    """Y[b, m, n] = act( (P[b, m, k] * gate[b, k]) @ W[k, n] + bias[n] ) (+ residual).

    One MXU dot per (batch, row-tile, col-tile); K = kk*C is the full contraction (no grid
    reduction, no accumulator scratch).  bf16 operands, f32 accumulation + epilogue, bf16 out.
    Grid is fully parallel (megacore-shardable); the weight block stays VMEM-resident across
    the row axis (index depends only on j)."""

    def kernel(*refs):
        p_ref, w_ref, b_ref = refs[0], refs[1], refs[2]
        idx = 3
        s_ref = None
        r_ref = None
        if has_gate:
            s_ref = refs[idx]; idx += 1
        if has_res:
            r_ref = refs[idx]; idx += 1
        o_ref = refs[idx]

        p = p_ref[0]                                   # (tm, K) bf16
        if has_gate:
            p = p * s_ref[0]                           # fused SE channel gate
        y = jnp.dot(p, w_ref[...], preferred_element_type=jnp.float32)
        y = y + b_ref[...]
        y = _apply_act(y, act)
        if has_res:
            y = y + r_ref[0].astype(jnp.float32)
        o_ref[0] = y.astype(o_ref.dtype)

    in_specs = [
        pl.BlockSpec((1, tm, kdim), lambda b, i, j: (b, i, 0)),   # patches (bf16)
        pl.BlockSpec((kdim, tn), lambda b, i, j: (0, j)),         # weights (bf16)
        pl.BlockSpec((1, tn), lambda b, i, j: (0, j)),            # bias (f32)
    ]
    if has_gate:
        in_specs.append(pl.BlockSpec((1, 1, kdim), lambda b, i, j: (b, 0, 0)))   # SE gate
    if has_res:
        in_specs.append(pl.BlockSpec((1, tm, tn), lambda b, i, j: (b, i, j)))    # residual

    flops = 2 * nb * mp * kdim * nout
    transcendentals = nb * mp * nout if act else 0
    bytes_accessed = (nb * mp * kdim * 2 + kdim * nout * 2 + nout * 4
                      + nb * mp * nout * 2
                      + (nb * mp * nout * 2 if has_res else 0)
                      + (nb * kdim * 2 if has_gate else 0))

    return jax.jit(pl.pallas_call(
        kernel,
        out_shape=jax.ShapeDtypeStruct((nb, mp, nout), out_dtype),
        grid=(nb, mp // tm, nout // tn),
        in_specs=in_specs,
        out_specs=pl.BlockSpec((1, tm, tn), lambda b, i, j: (b, i, j)),
        compiler_params=pltpu.CompilerParams(
            dimension_semantics=("parallel", "parallel", "parallel"),
            vmem_limit_bytes=VMEM_LIMIT),
        cost_estimate=pl.CostEstimate(
            flops=int(flops),
            transcendentals=int(transcendentals),
            bytes_accessed=int(bytes_accessed)),
    ))


@functools.lru_cache(maxsize=None)
def _dwconv_call(nb, hp, wp, c, h, w, k):
    """Direct depthwise conv + SiLU (stride 1, 'same'): reads the padded NHWC image per
    batch straight from its VMEM block (no im2col patch stack in HBM) and accumulates
    k*k shifted multiply-adds in f32."""

    def kernel(x_ref, w_ref, b_ref, o_ref):
        acc = jnp.broadcast_to(b_ref[...], (h, w, c)).astype(jnp.float32)
        for di in range(k):
            for dj in range(k):
                tap = x_ref[0, di:di + h, dj:dj + w, :].astype(jnp.float32)
                acc = acc + tap * w_ref[di * k + dj:di * k + dj + 1, :]
        y = acc * pl.reciprocal(1.0 + jnp.exp(-acc), approx=True)   # SiLU
        o_ref[0] = y.astype(o_ref.dtype)

    return jax.jit(pl.pallas_call(
        kernel,
        out_shape=jax.ShapeDtypeStruct((nb, h, w, c), jnp.bfloat16),
        grid=(nb,),
        in_specs=[pl.BlockSpec((1, hp, wp, c), lambda b: (b, 0, 0, 0)),
                  pl.BlockSpec((k * k, c), lambda b: (0, 0)),
                  pl.BlockSpec((1, c), lambda b: (0, 0))],
        out_specs=pl.BlockSpec((1, h, w, c), lambda b: (b, 0, 0, 0)),
        compiler_params=pltpu.CompilerParams(
            dimension_semantics=("parallel",),
            vmem_limit_bytes=VMEM_LIMIT),
    ))


@functools.lru_cache(maxsize=None)
def _avgpool_call(nb, hwp, tm, c, hw):
    """Global average pool: X[nb, hwp, c] (zero row-padded, bf16) -> (nb, c) f32.
    Tiled sum over hw with a resident output accumulator; 1/HW applied only in the last step."""
    inv = 1.0 / float(hw)
    nsteps = hwp // tm

    def kernel(x_ref, o_ref):
        @pl.when(pl.program_id(0) == 0)
        def _():
            o_ref[...] = jnp.zeros_like(o_ref)

        o_ref[...] += jnp.sum(x_ref[...].astype(jnp.float32), axis=1)

        @pl.when(pl.program_id(0) == nsteps - 1)
        def _():
            o_ref[...] = o_ref[...] * inv

    return jax.jit(pl.pallas_call(
        kernel,
        out_shape=jax.ShapeDtypeStruct((nb, c), jnp.float32),
        grid=(nsteps,),
        in_specs=[pl.BlockSpec((nb, tm, c), lambda i: (0, i, 0))],
        out_specs=pl.BlockSpec((nb, c), lambda i: (0, 0)),
        compiler_params=pltpu.CompilerParams(
            dimension_semantics=("arbitrary",),
            vmem_limit_bytes=VMEM_LIMIT),
    ))


# ----------------------------------------------------------------------------
# glue: patch extraction (kk folded into the channel axis), op wrappers

def _extract_patches(x, k, stride):
    """x: NHWC bf16 -> patches (N, Ho*Wo, k*k*C), 'same' padding (pad=(k-1)//2).
    TODO(synk): this still writes a kk-x patch tensor to HBM for 3x3 standard convs."""
    n, h, w, c = x.shape
    pad = (k - 1) // 2
    xp = jnp.pad(x, ((0, 0), (pad, pad), (pad, pad), (0, 0)))
    ho = (h + 2 * pad - k) // stride + 1
    wo = (w + 2 * pad - k) // stride + 1
    cols = []
    for i in range(k):
        for j in range(k):
            cols.append(xp[:, i:i + stride * (ho - 1) + 1:stride,
                           j:j + stride * (wo - 1) + 1:stride, :])
    p = jnp.concatenate(cols, axis=-1)                 # (n, ho, wo, k*k*c) bf16
    return p.reshape(n, ho * wo, k * k * c), ho, wo


def conv_matmul(patches, wb, act, residual=None, se_gate=None, out_dtype=jnp.bfloat16):
    """patches: (N, M, K) -> (N, M, nout) = act(conv) (+ residual), SE gate fused if given."""
    n, m, kdim = patches.shape
    w, b = wb                                          # w: (K, nout) bf16, b: (1, nout) f32
    nout = w.shape[-1]
    tn = 256 if (nout > 256 and nout % 256 == 0) else nout
    per_row = 2 * 2 * kdim + 2 * 2 * tn + (2 * 2 * tn if residual is not None else 0) + 64
    mp, tm = _choose_tm(m, per_row)
    if mp != m:
        patches = jnp.pad(patches, ((0, 0), (0, mp - m), (0, 0)))
        if residual is not None:
            residual = jnp.pad(residual, ((0, 0), (0, mp - m), (0, 0)))
    args = [patches.astype(jnp.bfloat16), w, b]
    if se_gate is not None:
        args.append(se_gate.reshape(n, 1, kdim).astype(jnp.bfloat16))
    if residual is not None:
        args.append(residual.astype(jnp.bfloat16))
    y = _conv_matmul_call(n, mp, tm, kdim, nout, tn, act,
                          se_gate is not None, residual is not None, out_dtype)(*args)
    return y[:, :m] if mp != m else y


def conv_bn_act(x, wb, k, stride, act, residual=None, se_gate=None):
    """Conv (BN folded) + activation (+ fused SE gate / residual).  x: NHWC bf16."""
    n, h, w_, c = x.shape
    if k == 1 and stride == 1:
        patches = x.reshape(n, h * w_, c)
        ho, wo = h, w_
    else:
        patches, ho, wo = _extract_patches(x, k, stride)
    res = residual.reshape(n, ho * wo, -1) if residual is not None else None
    y = conv_matmul(patches, wb, act, residual=res, se_gate=se_gate)
    return y.reshape(n, ho, wo, -1)


def dwconv_silu(x, wb, k, stride):
    """Depthwise conv (BN folded) + SiLU.  Stride 2 is handled by subsampling the stride-1
    output (only 2 such layers in the network)."""
    w, b = wb
    n, h, w_, c = x.shape
    pad = (k - 1) // 2
    xp = jnp.pad(x, ((0, 0), (pad, pad), (pad, pad), (0, 0)))
    y = _dwconv_call(n, h + 2 * pad, w_ + 2 * pad, c, h, w_, k)(xp, w, b)
    if stride > 1:
        y = y[:, ::stride, ::stride, :]
    return y


def global_avgpool(x):
    n, h, w_, c = x.shape
    hw = h * w_
    per_row = n * c * 2 * 2
    hwp, tm = _choose_tm(hw, per_row)
    xr = x.reshape(n, hw, c)
    if hwp != hw:
        xr = jnp.pad(xr, ((0, 0), (0, hwp - hw), (0, 0)))
    return _avgpool_call(n, hwp, tm, c, hw)(xr)


def se_gate(x, fc1, fc2):
    """Squeeze-excitation gate: avgpool -> fc1 + SiLU -> fc2 + sigmoid -> (N, C) gate."""
    n, h, w_, c = x.shape
    pooled = global_avgpool(x)                                    # (n, c) f32
    s1 = conv_matmul(pooled.reshape(n, 1, c), fc1, "silu")        # (n, 1, c_sq)
    s2 = conv_matmul(s1, fc2, "sigmoid")                          # (n, 1, c)
    return s2[:, 0]                                               # (n, c) bf16


# ----------------------------------------------------------------------------
# deterministic parameter construction (shapes follow torchvision efficientnet_v2_s)

_KEY = [jax.random.PRNGKey(0)]


def _rand(shape, scale):
    _KEY[0], k = jax.random.split(_KEY[0])
    return jax.random.normal(k, shape, jnp.float32) * scale


def make_conv_bn(cin, cout, k):
    """Conv2d(cin, cout, k, bias=False) + BN(eps=1e-3) folded; weight as (k*k*cin, cout) bf16."""
    w = _rand((cout, cin, k, k), math.sqrt(2.0 / (cin * k * k)))
    gamma = jnp.ones((cout,)); beta = jnp.zeros((cout,))
    mean = jnp.zeros((cout,)); var = jnp.ones((cout,))
    scale = gamma / jnp.sqrt(var + BN_EPS)
    wmat = jnp.transpose(w, (2, 3, 1, 0)).reshape(k * k * cin, cout) * scale[None, :]
    bias = (beta - mean * scale).reshape(1, cout)
    return wmat.astype(jnp.bfloat16), bias.astype(jnp.float32)


def make_dwconv_bn(c, k):
    """Depthwise Conv2d(c, c, k, groups=c, bias=False) + BN folded -> (k*k, c) f32."""
    # TODO(synk): BN fold assumes synthetic stats (mean=0, var=1, gamma=1, beta=0).
    w = _rand((c, 1, k, k), math.sqrt(2.0 / (k * k)))
    scale = 1.0 / math.sqrt(1.0 + BN_EPS)
    wmat = jnp.transpose(w[:, 0], (1, 2, 0)).reshape(k * k, c) * scale
    return wmat.astype(jnp.float32), jnp.zeros((1, c), jnp.float32)


def make_conv_bias(cin, cout):
    """1x1 Conv2d with bias (SE fc layers) -> (cin, cout) bf16."""
    w = _rand((cout, cin, 1, 1), math.sqrt(2.0 / cin))
    b = _rand((cout,), 0.01)
    wmat = jnp.transpose(w[:, :, 0, 0]).reshape(cin, cout)
    return wmat.astype(jnp.bfloat16), b.reshape(1, cout).astype(jnp.float32)


def make_linear(cin, cout):
    w = _rand((cout, cin), math.sqrt(1.0 / cin))
    b = _rand((cout,), 0.01)
    return (jnp.transpose(w).reshape(cin, cout).astype(jnp.bfloat16),
            b.reshape(1, cout).astype(jnp.float32))


def build_params():
    params = {"stem": make_conv_bn(3, STEM_OUT, 3)}
    blocks = []
    for (btype, expand, k, stride, cin_stage, cout_stage, layers) in CFG:
        for li in range(layers):
            cin = cin_stage if li == 0 else cout_stage
            cout = cout_stage
            s = stride if li == 0 else 1
            cexp = cin * expand
            bp = {"type": btype, "k": k, "stride": s, "cin": cin, "cout": cout}
            if btype == "fused":
                if cexp != cin:
                    bp["expand"] = make_conv_bn(cin, cexp, k)
                    bp["project"] = make_conv_bn(cexp, cout, 1)
                else:
                    bp["single"] = make_conv_bn(cin, cout, k)
            else:
                csq = max(1, cin // 4)
                bp["expand"] = make_conv_bn(cin, cexp, 1)
                bp["dw"] = make_dwconv_bn(cexp, k)
                bp["se_fc1"] = make_conv_bias(cexp, csq)
                bp["se_fc2"] = make_conv_bias(csq, cexp)
                bp["project"] = make_conv_bn(cexp, cout, 1)
            blocks.append(bp)
    params["blocks"] = blocks
    params["head"] = make_conv_bn(CFG[-1][5], HEAD_OUT, 1)
    params["classifier"] = make_linear(HEAD_OUT, NUM_CLASSES)
    return params


# ----------------------------------------------------------------------------
# forward pass

def run_block(x, bp):
    k, s = bp["k"], bp["stride"]
    # stochastic depth -> identity in eval mode; residual is fused into the last conv
    has_res = (s == 1 and bp["cin"] == bp["cout"])
    res = x if has_res else None
    if bp["type"] == "fused":
        if "single" in bp:
            return conv_bn_act(x, bp["single"], k, s, "silu", residual=res)
        y = conv_bn_act(x, bp["expand"], k, s, "silu")
        return conv_bn_act(y, bp["project"], 1, 1, None, residual=res)
    # MBConv: expand -> depthwise -> SE gate (fused into project) -> project (+res)
    y = conv_bn_act(x, bp["expand"], 1, 1, "silu")
    y = dwconv_silu(y, bp["dw"], k, s)
    gate = se_gate(y, bp["se_fc1"], bp["se_fc2"])
    return conv_bn_act(y, bp["project"], 1, 1, None, residual=res, se_gate=gate)


def forward(params, x_nchw):
    x = jnp.transpose(x_nchw, (0, 2, 3, 1)).astype(jnp.bfloat16)   # NCHW -> NHWC bf16
    x = conv_bn_act(x, params["stem"], 3, 2, "silu")
    for bp in params["blocks"]:
        x = run_block(x, bp)
    x = conv_bn_act(x, params["head"], 1, 1, "silu")
    pooled = global_avgpool(x)                                     # (N, 1280) f32
    # Dropout(0.2) is identity in eval mode.
    n = pooled.shape[0]
    logits = conv_matmul(pooled.reshape(n, 1, HEAD_OUT), params["classifier"], None,
                         out_dtype=jnp.float32)[:, 0]
    return logits                                                  # (N, num_classes) f32


# ----------------------------------------------------------------------------

if __name__ == "__main__":
    params = build_params()
    key = jax.random.PRNGKey(0)
    # PyTorch-style NCHW input; 3 channels and >=32 spatial required by EfficientNetV2-S.
    x = jax.random.normal(key, (2, 3, 32, 32), jnp.float32)
    fwd = jax.jit(functools.partial(forward, params))
    logits = jax.block_until_ready(fwd(x))
    assert logits.shape == (2, NUM_CLASSES)
    assert bool(jnp.all(jnp.isfinite(logits)))
    print("KERNEL_OK")
</pallas_src>

<mosaic_0001>
module attributes {stable_mosaic.version = 11 : i64} {
  func.func @kernel(%arg0: i32, %arg1: i32, %arg2: i32, %arg3: memref<1x256x27xbf16, #tpu.memory_space<vmem>>, %arg4: memref<27x24xbf16, #tpu.memory_space<vmem>>, %arg5: memref<1x24xf32, #tpu.memory_space<vmem>>, %arg6: memref<1x256x24xbf16, #tpu.memory_space<vmem>>) attributes {dimension_semantics = [#tpu.dimension_semantics<parallel>, #tpu.dimension_semantics<parallel>, #tpu.dimension_semantics<parallel>], iteration_bounds = array<i64: 2, 1, 1>, scalar_prefetch = 0 : i64, scratch_operands = 0 : i64, tpu.core_type = #tpu.core_type<tc>, window_params = [{transform_indices = @transform_0, window_bounds = array<i64: 1, 256, 27>}, {transform_indices = @transform_1, window_bounds = array<i64: 27, 24>}, {transform_indices = @transform_2, window_bounds = array<i64: 1, 24>}, {transform_indices = @transform_3, window_bounds = array<i64: 1, 256, 24>}]} {
    %c0 = arith.constant 0 : index
    %c0_0 = arith.constant 0 : index
    %c0_1 = arith.constant 0 : index
    %0 = vector.load %arg3[%c0, %c0_0, %c0_1] : memref<1x256x27xbf16, #tpu.memory_space<vmem>>, vector<1x256x27xbf16>
    %1 = vector.shape_cast %0 : vector<1x256x27xbf16> to vector<256x27xbf16>
    %c0_2 = arith.constant 0 : index
    %c0_3 = arith.constant 0 : index
    %2 = vector.load %arg4[%c0_2, %c0_3] : memref<27x24xbf16, #tpu.memory_space<vmem>>, vector<27x24xbf16>
    %cst = arith.constant dense<0.000000e+00> : vector<256x24xf32>
    %3 = tpu.matmul %1, %2, %cst {dimension_numbers = #tpu.dot_dimension_numbers<[1], [0], [0], [1], [0, 0, 1, 1], [], []>} : vector<256x27xbf16>, vector<27x24xbf16>, vector<256x24xf32> -> vector<256x24xf32>
    %c0_4 = arith.constant 0 : index
    %c0_5 = arith.constant 0 : index
    %4 = vector.load %arg5[%c0_4, %c0_5] : memref<1x24xf32, #tpu.memory_space<vmem>>, vector<1x24xf32>
    %5 = vector.broadcast %4 : vector<1x24xf32> to vector<256x24xf32>
    %6 = arith.addf %3, %5 : vector<256x24xf32>
    %cst_6 = arith.constant 0.000000e+00 : f32
    %7 = vector.broadcast %cst_6 : f32 to vector<256x24xf32>
    %8 = arith.subf %7, %6 : vector<256x24xf32>
    %9 = math.exp %8 : vector<256x24xf32>
    %cst_7 = arith.constant 1.000000e+00 : f32
    %10 = vector.broadcast %cst_7 : f32 to vector<256x24xf32>
    %11 = arith.addf %10, %9 : vector<256x24xf32>
    %12 = tpu.reciprocal %11 {approx = true} : vector<256x24xf32> -> vector<256x24xf32>
    %13 = arith.mulf %6, %12 : vector<256x24xf32>
    %14 = arith.truncf %13 : vector<256x24xf32> to vector<256x24xbf16>
    %c0_8 = arith.constant 0 : index
    %c0_9 = arith.constant 0 : index
    %c0_10 = arith.constant 0 : index
    %15 = vector.load %arg6[%c0_8, %c0_9, %c0_10] : memref<1x256x24xbf16, #tpu.memory_space<vmem>>, vector<1x256x24xbf16>
    %16 = vector.shape_cast %15 : vector<1x256x24xbf16> to vector<256x24xbf16>
    %17 = vector.shape_cast %14 : vector<256x24xbf16> to vector<1x256x24xbf16>
    tpu.vector_store %arg6[%c0_8, %c0_9, %c0_10], %17 {strides = array<i32>} : memref<1x256x24xbf16, #tpu.memory_space<vmem>>, vector<1x256x24xbf16>,
    return
  }
  func.func @transform_0(%arg0: i32, %arg1: i32, %arg2: i32) -> (i32, i32, i32) {
    %c0_i32 = arith.constant 0 : i32
    %c0_i32_0 = arith.constant 0 : i32
    return %arg0, %arg1, %c0_i32 : i32, i32, i32
  }
  func.func @transform_1(%arg0: i32, %arg1: i32, %arg2: i32) -> (i32, i32) {
    %c0_i32 = arith.constant 0 : i32
    %c0_i32_0 = arith.constant 0 : i32
    return %c0_i32, %arg2 : i32, i32
  }
  func.func @transform_2(%arg0: i32, %arg1: i32, %arg2: i32) -> (i32, i32) {
    %c0_i32 = arith.constant 0 : i32
    %c0_i32_0 = arith.constant 0 : i32
    return %c0_i32, %arg2 : i32, i32
  }
  func.func @transform_3(%arg0: i32, %arg1: i32, %arg2: i32) -> (i32, i32, i32) {
    %c0_i32 = arith.constant 0 : i32
    return %arg0, %arg1, %arg2 : i32, i32, i32
  }
}

</mosaic_0001>

<bundles_post_ra>
// kernel: tpu_custom_call.1
= control target key start
LH: loop header
LB: loop body
LE: loop exit
PB: predicated region body
PF: predicated region fallthrough
CT: control target
= control target key end

     0   :  { %s1476_s12 = smov 0   ;;  %s1478_s13 = smov 0   ;;  %s1814_s0 = inlined_call_operand.vmem [shape: bf16[2,256,27], index: 0, kind: input, shape index: {}]   ;;  %s1815_s1 = inlined_call_operand.vmem [shape: bf16[27,24], index: 1, kind: input, shape index: {}]   ;;  %s1816_s2 = inlined_call_operand.vmem [shape: f32[1,24], index: 2, kind: input, shape index: {}]   ;;  %s1817_s3 = inlined_call_operand.vmem [shape: bf16[2,256,24], index: 3, kind: output, shape index: {}]  }
   0x1   :  { %s1480_s14 = smov 0  }
   0x2 LB: > { %s32_s15 = sadd.s32 1, %s1449_s13  ;;  %p1094_p0 = scmp.ge.s32.totalorder %s1453_s14, 1  ;;  %s1453_s14 = sphi %s1480_s14, %s13_s14   ;;  %s1449_s13 = sphi %s1478_s13, %s1819_s13   ;;  %s1445_s12 = sphi %s1476_s12, %s1818_s12  }
   0x3   : > { %p34_p1 = scmp.ge.s32.totalorder %s32_s15, 2  ;;  %p184_p2 = scmp.lt.s32.totalorder %s1453_s14, 3 }
   0x5   : > { %s1821_s15 = smov (%p34_p1, %s32_s15), 0  ;;  %p185_p3 = pnand %p1094_p0, %p184_p2 }
   0x6   : > { %v1285_v0 = vld [vmem:[%s1815_s1] sm:$0xff] (!%p185_p3)   ;;  %vm440_vm0 = vcmask (!%p185_p3), 1044480   ;;  %v1286_v1 = vld [vmem:[%s1815_s1 + $0x8] sm:$0x3f] (!%p185_p3)   ;;  %vm441_vm1 = vcmask (!%p185_p3), 1045504   ;;  %p227_p4 = scmp.lt.s32.totalorder (!%p185_p3), %s1445_s12, 1 }
   0x7   : > { %188 = sbr.rel (%p185_p3) target bundleno = 325 (0x145), region = 32  ;;  %1220 = vmatprep.subr.bf16.mxu0 (!%p185_p3), %v1285_v0  ;;  %1256 = vmatprep.subr.bf16.mxu1 (!%p185_p3), %v1285_v0  ;;  %v1455_v2 = vmov (!%p185_p3), 65535   ;;  %vm391_vm2 = vcmask (!%p185_p3), 220160   ;;  %v1545_v22 = vld [vmem:[%s1816_s2] ss:$0 sm:$0xff] (!%p185_p3)  ;;  %vm928_vm3 = vcmask (!%p185_p3), 191488  }
   0x8   : > { %1221 = vmatpush3.bf16.msra.mxu0 (!%p185_p3), %v1285_v0  ;;  %1258 = vmatpush3.bf16.msra.mxu1 (!%p185_p3), %v1285_v0  ;;  %v442_v3 = vsel (!%p185_p3), %vm440_vm0, 4294967295, %v1455_v2 }
   0x9   : > { %v443_v4 = vsel (!%p185_p3), %vm441_vm1, %v442_v3, 0 }
   0xa   : > { %v445_v5 = vand.u32 (!%p185_p3), %v1286_v1, %v443_v4 }
   0xc   : > { %1222 = vmatprep.subr.bf16.mxu0 (!%p185_p3), %v445_v5  ;;  %1257 = vmatprep.subr.bf16.mxu1 (!%p185_p3), %v445_v5 }
   0xd   : > { %1223 = vmatpush3.bf16.msra.mxu0 (!%p185_p3), %v445_v5  ;;  %1259 = vmatpush3.bf16.msra.mxu1 (!%p185_p3), %v445_v5 }
   0xe   : > { %s1823_s12 = smov (!%p227_p4, %s1445_s12), 1 }
   0xf   : > { %s1168_s20 = sshll.u32 %s1823_s12, 7 }
  0x10   : > { %s1508_s23 = scalar_lea.vmem %s1814_s0, %s1168_s20  ;;  %s1667_s28 = scalar_lea.vmem %s1817_s3, %s1168_s20 }
  0x11   : > { %v1287_v6 = vld [vmem:[%s1508_s23] sm:$0xff]   ;;  %v1289_v8 = vld [vmem:[%s1508_s23 + $0x8] sm:$0xff]   ;;  %v1291_v10 = vld [vmem:[%s1508_s23 + $0x10] sm:$0xff]  }
  0x12   : > { %v1288_v7 = vld [vmem:[%s1508_s23 + $0x40] sm:$0xff]   ;;  %1224 = vmatprep.mubr.msk.bf16.mxu0 %vm391_vm2, %v1287_v6  ;;  %v1290_v9 = vld [vmem:[%s1508_s23 + $0x48] sm:$0xff]   ;;  %v1292_v11 = vld [vmem:[%s1508_s23 + $0x50] sm:$0xff]  }
  0x13   : > { %1240 = vmatprep.mubr.msk.bf16.mxu1 %vm391_vm2, %v1288_v7  ;;  %1225 = vmatmul.mubr.msk.bf16.vlgmr.msra.gmra.mrb[0].mxu0 %vm391_vm2, %v1289_v8  ;;  %v1293_v12 = vld [vmem:[%s1508_s23 + $0x18] sm:$0xff]   ;;  %v1295_v14 = vld [vmem:[%s1508_s23 + $0x20] sm:$0xff]   ;;  %v1297_v16 = vld [vmem:[%s1508_s23 + $0x28] sm:$0xff]  }
  0x14   : > { %1241 = vmatmul.mubr.msk.bf16.vlgmr.msra.gmra.mrb[0].mxu1 %vm391_vm2, %v1290_v9  ;;  %1228 = vmatprep.mubr.msk.bf16.mxu0 %vm391_vm2, %v1291_v10  ;;  %v1294_v13 = vld [vmem:[%s1508_s23 + $0x58] sm:$0xff]   ;;  %v1296_v15 = vld [vmem:[%s1508_s23 + $0x60] sm:$0xff]   ;;  %v1298_v17 = vld [vmem:[%s1508_s23 + $0x68] sm:$0xff]  }
  0x15   : > { %1244 = vmatprep.mubr.msk.bf16.mxu1 %vm391_vm2, %v1292_v11  ;;  %v1299_v18 = vld [vmem:[%s1508_s23 + $0x30] sm:$0xff]   ;;  %v1301_v20 = vld [vmem:[%s1508_s23 + $0x38] sm:$0xff]  }
  0x16   : > { %v1300_v19 = vld [vmem:[%s1508_s23 + $0x70] sm:$0xff]   ;;  %v1302_v21 = vld [vmem:[%s1508_s23 + $0x78] sm:$0xff]  }
  0x1b   : > { %1229 = vmatmul.mubr.msk.bf16.gmra.mrb[4].mxu0 %vm391_vm2, %v1293_v12 }
  0x1c   : > { %1245 = vmatmul.mubr.msk.bf16.gmra.mrb[4].mxu1 %vm391_vm2, %v1294_v13  ;;  %1232 = vmatprep.mubr.msk.bf16.mxu0 %vm391_vm2, %v1295_v14 }
  0x1d   : > { %1248 = vmatprep.mubr.msk.bf16.mxu1 %vm391_vm2, %v1296_v15 }
  0x23   : > { %1233 = vmatmul.mubr.msk.bf16.gmra.mrb[8].mxu0 %vm391_vm2, %v1297_v16 }
  0x24   : > { %1249 = vmatmul.mubr.msk.bf16.gmra.mrb[8].mxu1 %vm391_vm2, %v1298_v17  ;;  %1236 = vmatprep.mubr.msk.bf16.mxu0 %vm391_vm2, %v1299_v18 }
  0x25   : > { %1252 = vmatprep.mubr.msk.bf16.mxu1 %vm391_vm2, %v1300_v19 }
  0x2b   : > { %1237 = vmatmul.mubr.msk.bf16.gmra.mrb[12].mxu0 %vm391_vm2, %v1301_v20 }
  0x2c   : > { %1253 = vmatmul.mubr.msk.bf16.gmra.mrb[12].mxu1 %vm391_vm2, %v1302_v21 }
  0xe6   : > { %v1226_v23 = vpop.f32.mrb[0].mxu0 }
  0xe7   : > { %v1548_v24 = vadd.f32 %v1226_v23, %v1545_v22  ;;  %v1242_v25 = vpop.f32.mrb[0].mxu1  ;;  %v481_v26 = vpop.f32.mrb[1].mxu0 }
  0xe8   : > { %v1551_v27 = vadd.f32 %v1242_v25, %v1545_v22  ;;  %v1554_v28 = vadd.f32 %v1545_v22, %v481_v26  ;;  %v545_v29 = vpop.f32.mrb[1].mxu1  ;;  %v1227_v30 = vpop.f32.mrb[2].mxu0 }
  0xe9   : > { %v610_v31 = vsub.f32 0.0, %v1548_v24  ;;  %v1558_v32 = vadd.f32 %v1545_v22, %v545_v29  ;;  %v1561_v33 = vadd.f32 %v1227_v30, %v1545_v22  ;;  %v1243_v34 = vpop.f32.mrb[2].mxu1  ;;  %v484_v35 = vpop.f32.mrb[3].mxu0 }
  0xea   : > { %v626_v36 = vsub.f32 0.0, %v1551_v27  ;;  %v608_v37 = vsub.f32 0.0, %v1554_v28  ;;  %v1566_v38 = vadd.f32 %v1243_v34, %v1545_v22  ;;  %v1569_v39 = vadd.f32 %v1545_v22, %v484_v35  ;;  %v548_v40 = vpop.f32.mrb[3].mxu1 }
  0xeb   : > { %v644_v41 = vmul.f32 1.442695, %v610_v31  ;;  %v624_v42 = vsub.f32 0.0, %v1558_v32  ;;  %v611_v43 = vsub.f32 0.0, %v1561_v33  ;;  %v1574_v44 = vadd.f32 %v1545_v22, %v548_v40 }
  0xec   : > { %v676_v45 = vmul.f32 1.442695, %v626_v36  ;;  %v640_v46 = vmul.f32 1.442695, %v608_v37  ;;  %v627_v47 = vsub.f32 0.0, %v1566_v38  ;;  %v609_v48 = vsub.f32 0.0, %v1569_v39 }
  0xed   : > { %1303 = vpow2.f32 %v644_v41  ;;  %v672_v49 = vmul.f32 1.442695, %v624_v42  ;;  %v646_v50 = vmul.f32 1.442695, %v611_v43  ;;  %v625_v51 = vsub.f32 0.0, %v1574_v44 }
  0xee   : > { %1305 = vpow2.f32 %v676_v45  ;;  %v678_v52 = vmul.f32 1.442695, %v627_v47  ;;  %v1230_v53 = vpop.f32.mrb[4].mxu0  ;;  %v642_v54 = vmul.f32 1.442695, %v609_v48 }
  0xef   : > { %1307 = vpow2.f32 %v640_v46  ;;  %v1580_v55 = vadd.f32 %v1230_v53, %v1545_v22  ;;  %v1246_v56 = vpop.f32.mrb[4].mxu1  ;;  %v497_v57 = vpop.f32.mrb[5].mxu0  ;;  %v674_v58 = vmul.f32 1.442695, %v625_v51 }
  0xf0   : > { %1309 = vpow2.f32 %v672_v49  ;;  %v1583_v59 = vadd.f32 %v1246_v56, %v1545_v22  ;;  %v1586_v60 = vadd.f32 %v1545_v22, %v497_v57  ;;  %v561_v61 = vpop.f32.mrb[5].mxu1  ;;  %v1231_v62 = vpop.f32.mrb[6].mxu0 }
  0xf1   : > { %1311 = vpow2.f32 %v646_v50  ;;  %v614_v63 = vsub.f32 0.0, %v1580_v55  ;;  %v1590_v0 = vadd.f32 %v1545_v22, %v561_v61  ;;  %v1593_v1 = vadd.f32 %v1231_v62, %v1545_v22  ;;  %v1247_v2 = vpop.f32.mrb[6].mxu1  ;;  %v500_v3 = vpop.f32.mrb[7].mxu0 }
  0xf2   : > { %1313 = vpow2.f32 %v678_v52  ;;  %v630_v4 = vsub.f32 0.0, %v1583_v59  ;;  %v612_v5 = vsub.f32 0.0, %v1586_v60  ;;  %v1598_v6 = vadd.f32 %v1247_v2, %v1545_v22  ;;  %v564_v7 = vpop.f32.mrb[7].mxu1 }
  0xf3   : > { %1315 = vpow2.f32 %v642_v54  ;;  %v652_v8 = vmul.f32 1.442695, %v614_v63  ;;  %v628_v9 = vsub.f32 0.0, %v1590_v0  ;;  %v615_v10 = vsub.f32 0.0, %v1593_v1 }
  0xf4   : > { %1317 = vpow2.f32 %v674_v58  ;;  %v684_v11 = vmul.f32 1.442695, %v630_v4  ;;  %v648_v12 = vmul.f32 1.442695, %v612_v5  ;;  %v631_v15 = vsub.f32 0.0, %v1598_v6 }
  0xf5   : > { %1319 = vpow2.f32 %v652_v8  ;;  %v680_v13 = vmul.f32 1.442695, %v628_v9  ;;  %v654_v14 = vmul.f32 1.442695, %v615_v10  ;;  %v1604_v23 = vadd.f32 %v1545_v22, %v500_v3 }
  0xf6   : > { %1321 = vpow2.f32 %v684_v11  ;;  %v1234_v16 = vpop.f32.mrb[8].mxu0  ;;  %v1607_v31 = vadd.f32 %v1545_v22, %v564_v7  ;;  %v1611_v40 = vmul.f32 1.442695, %v631_v15 }
  0xf7   : > { %v1304_v17 = vpop.eup %1303  ;;  %1323 = vpow2.f32 %v648_v12  ;;  %v1250_v18 = vpop.f32.mrb[8].mxu1  ;;  %v1614_v41 = vadd.f32 %v1234_v16, %v1545_v22  ;;  %v613_v50 = vsub.f32 0.0, %v1604_v23 }
  0xf8   : > { %v513_v19 = vpop.f32.mrb[9].mxu0  ;;  %v1306_v20 = vpop.eup %1305  ;;  %v706_v21 = vadd.f32 1.0, %v1304_v17  ;;  %1325 = vpow2.f32 %v680_v13  ;;  %v1619_v46 = vadd.f32 %v1250_v18, %v1545_v22  ;;  %v629_v54 = vsub.f32 0.0, %v1607_v31 }
  0xf9   : > { %v577_v25 = vpop.f32.mrb[9].mxu1  ;;  %v1235_v26 = vpop.f32.mrb[10].mxu0  ;;  %v722_v30 = vadd.f32 1.0, %v1306_v20  ;;  %1327 = vpow2.f32 %v654_v14  ;;  %v1622_v47 = vadd.f32 %v1545_v22, %v513_v19  ;;  %v618_v61 = vsub.f32 0.0, %v1614_v41 }
  0xfa   : > { %v1308_v29 = vpop.eup %1307  ;;  %v1251_v34 = vpop.f32.mrb[10].mxu1  ;;  %1329 = vrcp.f32 %v706_v21  ;;  %v1626_v51 = vadd.f32 %v1545_v22, %v577_v25  ;;  %v1630_v56 = vadd.f32 %v1235_v26, %v1545_v22  ;;  %v634_v4 = vsub.f32 0.0, %v1619_v46 }
  0xfb   : > { %v1609_v35 = vpop.f32.mrb[11].mxu0  ;;  %v1310_v36 = vpop.eup %1309  ;;  %v704_v37 = vadd.f32 1.0, %v1308_v29  ;;  %1331 = vrcp.f32 %v722_v30  ;;  %v1634_v62 = vadd.f32 %v1251_v34, %v1545_v22  ;;  %v616_v5 = vsub.f32 0.0, %v1622_v47 }
  0xfc   : > { %v1616_v42 = vpop.f32.mrb[11].mxu1  ;;  %v1312_v43 = vpop.eup %1311  ;;  %v720_v45 = vadd.f32 1.0, %v1310_v36  ;;  %v650_v11 = vmul.f32 1.442695, %v613_v50  ;;  %v632_v12 = vsub.f32 0.0, %v1626_v51  ;;  %v619_v18 = vsub.f32 0.0, %v1630_v56 }
  0xfd   : > { %v1314_v48 = vpop.eup %1313  ;;  %1333 = vrcp.f32 %v704_v37  ;;  %v707_v49 = vadd.f32 1.0, %v1312_v43  ;;  %v682_v17 = vmul.f32 1.442695, %v629_v54  ;;  %v660_v26 = vmul.f32 1.442695, %v618_v61 }
  0xfe   : > { %v1316_v52 = vpop.eup %1315  ;;  %1335 = vrcp.f32 %v720_v45  ;;  %v723_v53 = vadd.f32 1.0, %v1314_v48  ;;  %v1238_v63 = vpop.f32.mrb[12].mxu0  ;;  %v635_v29 = vsub.f32 0.0, %v1634_v62  ;;  %v692_v37 = vmul.f32 1.442695, %v634_v4 }
  0xff   : > { %v1318_v57 = vpop.eup %1317  ;;  %1337 = vrcp.f32 %v707_v49  ;;  %v705_v58 = vadd.f32 1.0, %v1316_v52  ;;  %v1254_v7 = vpop.f32.mrb[12].mxu1  ;;  %v656_v43 = vmul.f32 1.442695, %v616_v5  ;;  %v688_v49 = vmul.f32 1.442695, %v632_v12 }
 0x100   : > { %v1320_v2 = vpop.eup %1319  ;;  %1339 = vrcp.f32 %v723_v53  ;;  %v721_v3 = vadd.f32 1.0, %v1318_v57  ;;  %v1638_v8 = vpop.f32.mrb[13].mxu0  ;;  %v1655_v50 = vadd.f32 %v1545_v22, %v1609_v35  ;;  %v662_v54 = vmul.f32 1.442695, %v619_v18 }
 0x101   : > { %v1322_v9 = vpop.eup %1321  ;;  %1341 = vrcp.f32 %v705_v58  ;;  %v710_v10 = vadd.f32 1.0, %v1320_v2  ;;  %v1641_v13 = vpop.f32.mrb[13].mxu1  ;;  %v1660_v57 = vadd.f32 %v1545_v22, %v1616_v42  ;;  %v694_v61 = vmul.f32 1.442695, %v635_v29 }
 0x102   : > { %v1643_v14 = vpop.f32.mrb[14].mxu0  ;;  %v1324_v15 = vpop.eup %1323  ;;  %1343 = vrcp.f32 %v721_v3  ;;  %v726_v16 = vadd.f32 1.0, %v1322_v9  ;;  %v1676_v4 = vadd.f32 %v1254_v7, %v1545_v22 }
 0x103   : > { %v1646_v19 = vpop.f32.mrb[14].mxu1  ;;  %v1648_v20 = vpop.f32.mrb[15].mxu0  ;;  %1345 = vrcp.f32 %v710_v10  ;;  %v708_v25 = vadd.f32 1.0, %v1324_v15 }
 0x104   : > { %v1326_v21 = vpop.eup %1325  ;;  %v1651_v30 = vpop.f32.mrb[15].mxu1  ;;  %1347 = vrcp.f32 %v726_v16 }
 0x105   : > { %v1328_v34 = vpop.eup %1327  ;;  %v724_v36 = vadd.f32 1.0, %v1326_v21  ;;  %1349 = vrcp.f32 %v708_v25 }
 0x106   : > { %v1330_v45 = vpop.eup %1329  ;;  %v711_v48 = vadd.f32 1.0, %v1328_v34 }
 0x107   : > { %v1332_v52 = vpop.eup %1331  ;;  %v770_v53 = vmul.f32 %v1330_v45, %v1548_v24  ;;  %1351 = vrcp.f32 %v724_v36  ;;  %v1671_v24 = vadd.f32 %v1238_v63, %v1545_v22 }
 0x108   : > { %v1334_v58 = vpop.eup %1333  ;;  %v786_v35 = vmul.f32 %v1332_v52, %v1551_v27  ;;  %1353 = vrcp.f32 %v711_v48  ;;  %v617_v27 = vsub.f32 0.0, %v1655_v50 }
 0x109   : > { %v1336_v2 = vpop.eup %1335  ;;  %v1172_v3 = vpack.c.bf16 %v770_v53, %v770_v53  ;;  %v768_v42 = vmul.f32 %v1334_v58, %v1554_v28  ;;  %1355 = vpow2.f32 %v1611_v40  ;;  %v633_v28 = vsub.f32 0.0, %v1660_v57 }
 0x10a   : > { %v1338_v5 = vpop.eup %1337  ;;  %v1188_v9 = vpack.c.bf16 %v786_v35, %v786_v35  ;;  %v784_v10 = vmul.f32 %v1336_v2, %v1558_v32  ;;  %1357 = vpow2.f32 %v650_v11  ;;  %v622_v11 = vsub.f32 0.0, %v1671_v24 }
 0x10b   : > { %v1340_v63 = vpop.eup %1339  ;;  %931 = vst.msk [vmem:[%s1667_s28 + $0x8] sm:$0xf] %vm928_vm3, %v1172_v3  ;;  %v1170_v12 = vpack.c.bf16 %v768_v42, %v768_v42  ;;  %v771_v15 = vmul.f32 %v1338_v5, %v1561_v33  ;;  %1359 = vpow2.f32 %v682_v17  ;;  %v638_v17 = vsub.f32 0.0, %v1676_v4 }
 0x10c   : > { %v1342_v40 = vpop.eup %1341  ;;  %947 = vst.msk [vmem:[%s1667_s28 + $0x48] sm:$0xf] %vm928_vm3, %v1188_v9  ;;  %v1186_v7 = vpack.c.bf16 %v784_v10, %v784_v10  ;;  %v787_v32 = vmul.f32 %v1340_v63, %v1566_v38  ;;  %1361 = vpow2.f32 %v660_v26  ;;  %v658_v26 = vmul.f32 1.442695, %v617_v27 }
 0x10d   : > { %v1344_v16 = vpop.eup %1343  ;;  %929 = vst.msk [vmem:[%s1667_s28] sm:$0xf] %vm928_vm3, %v1170_v12  ;;  %v1173_v18 = vpack.c.bf16 %v771_v15, %v771_v15  ;;  %v769_v33 = vmul.f32 %v1342_v40, %v1569_v39  ;;  %1363 = vpow2.f32 %v692_v37  ;;  %v690_v39 = vmul.f32 1.442695, %v633_v28 }
 0x10e   : > { %v1346_v21 = vpop.eup %1345  ;;  %945 = vst.msk [vmem:[%s1667_s28 + $0x40] sm:$0xf] %vm928_vm3, %v1186_v7  ;;  %v1189_v25 = vpack.c.bf16 %v787_v32, %v787_v32  ;;  %v785_v38 = vmul.f32 %v1344_v16, %v1574_v44  ;;  %1365 = vpow2.f32 %v656_v43  ;;  %v668_v44 = vmul.f32 1.442695, %v622_v11 }
 0x10f   : > { %v1348_v29 = vpop.eup %1347  ;;  %932 = vst.msk [vmem:[%s1667_s28 + $0xc] sm:$0xf] %vm928_vm3, %v1173_v18  ;;  %v1171_v34 = vpack.c.bf16 %v769_v33, %v769_v33  ;;  %v774_v36 = vmul.f32 %v1346_v21, %v1580_v55  ;;  %1367 = vpow2.f32 %v688_v49  ;;  %v700_v55 = vmul.f32 1.442695, %v638_v17 }
 0x110   : > { %v1350_v37 = vpop.eup %1349  ;;  %948 = vst.msk [vmem:[%s1667_s28 + $0x4c] sm:$0xf] %vm928_vm3, %v1189_v25  ;;  %v1187_v45 = vpack.c.bf16 %v785_v38, %v785_v38  ;;  %v790_v48 = vmul.f32 %v1348_v29, %v1583_v59  ;;  %1369 = vpow2.f32 %v662_v54  ;;  %v1720_v63 = vadd.f32 %v1545_v22, %v1638_v8 }
 0x111   : > { %v1352_v43 = vpop.eup %1351  ;;  %930 = vst.msk [vmem:[%s1667_s28 + $0x4] sm:$0xf] %vm928_vm3, %v1171_v34  ;;  %v1176_v52 = vpack.c.bf16 %v774_v36, %v774_v36  ;;  %v772_v53 = vmul.f32 %v1350_v37, %v1586_v60  ;;  %1371 = vpow2.f32 %v694_v61  ;;  %v1724_v28 = vadd.f32 %v1545_v22, %v1641_v13 }
 0x112   : > { %v1354_v49 = vpop.eup %1353  ;;  %946 = vst.msk [vmem:[%s1667_s28 + $0x44] sm:$0xf] %vm928_vm3, %v1187_v45  ;;  %v1192_v58 = vpack.c.bf16 %v790_v48, %v790_v48  ;;  %v788_v35 = vmul.f32 %v1352_v43, %v1590_v0  ;;  %1373 = vpow2.f32 %v658_v26  ;;  %v1728_v32 = vadd.f32 %v1643_v14, %v1545_v22 }
 0x113   : > { %v1356_v59 = vpop.eup %1355  ;;  %935 = vst.msk [vmem:[%s1667_s28 + $0x18] sm:$0xf] %vm928_vm3, %v1176_v52  ;;  %v1174_v54 = vpack.c.bf16 %v772_v53, %v772_v53  ;;  %v775_v2 = vmul.f32 %v1354_v49, %v1593_v1  ;;  %1375 = vpow2.f32 %v690_v39  ;;  %v1732_v8 = vadd.f32 %v1646_v19, %v1545_v22 }
 0x114   : > { %v1358_v60 = vpop.eup %1357  ;;  %951 = vst.msk [vmem:[%s1667_s28 + $0x58] sm:$0xf] %vm928_vm3, %v1192_v58  ;;  %v1190_v61 = vpack.c.bf16 %v788_v35, %v788_v35  ;;  %v727_v3 = vadd.f32 1.0, %v1356_v59  ;;  %1377 = vpow2.f32 %v668_v44  ;;  %v620_v13 = vsub.f32 0.0, %v1720_v63 }
 0x115   : > { %v1360_v42 = vpop.eup %1359  ;;  %933 = vst.msk [vmem:[%s1667_s28 + $0x10] sm:$0xf] %vm928_vm3, %v1174_v54  ;;  %v1177_v0 = vpack.c.bf16 %v775_v2, %v775_v2  ;;  %v709_v5 = vadd.f32 1.0, %v1358_v60  ;;  %1379 = vpow2.f32 %v700_v55  ;;  %v1737_v17 = vadd.f32 %v1545_v22, %v1648_v20 }
 0x116   : > { %v1362_v9 = vpop.eup %1361  ;;  %949 = vst.msk [vmem:[%s1667_s28 + $0x50] sm:$0xf] %vm928_vm3, %v1190_v61  ;;  %1381 = vrcp.f32 %v727_v3  ;;  %v725_v10 = vadd.f32 1.0, %v1360_v42  ;;  %v636_v25 = vsub.f32 0.0, %v1724_v28  ;;  %v1742_v38 = vadd.f32 %v1545_v22, %v1651_v30 }
 0x117   : > { %v1364_v1 = vpop.eup %1363  ;;  %936 = vst.msk [vmem:[%s1667_s28 + $0x1c] sm:$0xf] %vm928_vm3, %v1177_v0  ;;  %1383 = vrcp.f32 %v709_v5  ;;  %v714_v27 = vadd.f32 1.0, %v1362_v9  ;;  %v623_v29 = vsub.f32 0.0, %v1728_v32  ;;  %v639_v20 = vsub.f32 0.0, %v1732_v8 }
 0x118   : > { %v1366_v12 = vpop.eup %1365  ;;  %1385 = vrcp.f32 %v725_v10  ;;  %v730_v15 = vadd.f32 1.0, %v1364_v1  ;;  %v664_v45 = vmul.f32 1.442695, %v620_v13  ;;  %v621_v48 = vsub.f32 0.0, %v1737_v17 }
 0x119   : > { %v1368_v40 = vpop.eup %1367  ;;  %1387 = vrcp.f32 %v714_v27  ;;  %v712_v7 = vadd.f32 1.0, %v1366_v12  ;;  %v696_v30 = vmul.f32 1.442695, %v636_v25  ;;  %v637_v43 = vsub.f32 0.0, %v1742_v38 }
 0x11a   : > { %v1370_v11 = vpop.eup %1369  ;;  %1389 = vrcp.f32 %v730_v15  ;;  %v728_v16 = vadd.f32 1.0, %v1368_v40  ;;  %v670_v55 = vmul.f32 1.442695, %v623_v29  ;;  %v702_v35 = vmul.f32 1.442695, %v639_v20 }
 0x11b   : > { %v1372_v18 = vpop.eup %1371  ;;  %1391 = vrcp.f32 %v712_v7  ;;  %v715_v33 = vadd.f32 1.0, %v1370_v11  ;;  %v666_v60 = vmul.f32 1.442695, %v621_v48  ;;  %v698_v42 = vmul.f32 1.442695, %v637_v43 }
 0x11c   : > { %v1374_v21 = vpop.eup %1373  ;;  %1393 = vrcp.f32 %v728_v16  ;;  %v731_v14 = vadd.f32 1.0, %v1372_v18 }
 0x11d   : > { %v1376_v19 = vpop.eup %1375  ;;  %1395 = vrcp.f32 %v715_v33  ;;  %v713_v26 = vadd.f32 1.0, %v1374_v21 }
 0x11e   : > { %v1378_v34 = vpop.eup %1377  ;;  %1397 = vrcp.f32 %v731_v14  ;;  %v729_v36 = vadd.f32 1.0, %v1376_v19 }
 0x11f   : > { %v1380_v39 = vpop.eup %1379  ;;  %1399 = vrcp.f32 %v713_v26  ;;  %v718_v37 = vadd.f32 1.0, %v1378_v34 }
 0x120   : > { %v1382_v44 = vpop.eup %1381  ;;  %1401 = vrcp.f32 %v729_v36  ;;  %v734_v22 = vadd.f32 1.0, %v1380_v39 }
 0x121   : > { %v1384_v52 = vpop.eup %1383  ;;  %v791_v53 = vmul.f32 %v1382_v44, %v1598_v6  ;;  %1403 = vrcp.f32 %v718_v37 }
 0x122   : > { %v1386_v49 = vpop.eup %1385  ;;  %v773_v58 = vmul.f32 %v1384_v52, %v1604_v23  ;;  %1405 = vrcp.f32 %v734_v22 }
 0x123   : > { %v1388_v59 = vpop.eup %1387  ;;  %v1193_v54 = vpack.c.bf16 %v791_v53, %v791_v53  ;;  %v789_v2 = vmul.f32 %v1386_v49, %v1607_v31  ;;  %1407 = vpow2.f32 %v664_v45 }
 0x124   : > { %v1390_v61 = vpop.eup %1389  ;;  %v1175_v3 = vpack.c.bf16 %v773_v58, %v773_v58  ;;  %v778_v6 = vmul.f32 %v1388_v59, %v1614_v41  ;;  %1409 = vpow2.f32 %v696_v30 }
 0x125   : > { %v1392_v0 = vpop.eup %1391  ;;  %952 = vst.msk [vmem:[%s1667_s28 + $0x5c] sm:$0xf] %vm928_vm3, %v1193_v54  ;;  %v1191_v23 = vpack.c.bf16 %v789_v2, %v789_v2  ;;  %v794_v5 = vmul.f32 %v1390_v61, %v1619_v46  ;;  %1411 = vpow2.f32 %v670_v55 }
 0x126   : > { %v1394_v9 = vpop.eup %1393  ;;  %934 = vst.msk [vmem:[%s1667_s28 + $0x14] sm:$0xf] %vm928_vm3, %v1175_v3  ;;  %v1180_v31 = vpack.c.bf16 %v778_v6, %v778_v6  ;;  %v776_v10 = vmul.f32 %v1392_v0, %v1622_v47  ;;  %1413 = vpow2.f32 %v702_v35 }
 0x127   : > { %v1396_v41 = vpop.eup %1395  ;;  %950 = vst.msk [vmem:[%s1667_s28 + $0x54] sm:$0xf] %vm928_vm3, %v1191_v23  ;;  %v1196_v1 = vpack.c.bf16 %v794_v5, %v794_v5  ;;  %v792_v27 = vmul.f32 %v1394_v9, %v1626_v51  ;;  %1415 = vpow2.f32 %v666_v60 }
 0x128   : > { %v1398_v12 = vpop.eup %1397  ;;  %939 = vst.msk [vmem:[%s1667_s28 + $0x28] sm:$0xf] %vm928_vm3, %v1180_v31  ;;  %v1178_v46 = vpack.c.bf16 %v776_v10, %v776_v10  ;;  %v779_v15 = vmul.f32 %v1396_v41, %v1630_v56  ;;  %1417 = vpow2.f32 %v698_v42 }
 0x129   : > { %v1400_v40 = vpop.eup %1399  ;;  %955 = vst.msk [vmem:[%s1667_s28 + $0x68] sm:$0xf] %vm928_vm3, %v1196_v1  ;;  %v1194_v47 = vpack.c.bf16 %v792_v27, %v792_v27  ;;  %v795_v7 = vmul.f32 %v1398_v12, %v1634_v62 }
 0x12a   : > { %v1402_v11 = vpop.eup %1401  ;;  %937 = vst.msk [vmem:[%s1667_s28 + $0x20] sm:$0xf] %vm928_vm3, %v1178_v46  ;;  %v1181_v51 = vpack.c.bf16 %v779_v15, %v779_v15  ;;  %v777_v16 = vmul.f32 %v1400_v40, %v1655_v50 }
 0x12b   : > { %v1404_v18 = vpop.eup %1403  ;;  %953 = vst.msk [vmem:[%s1667_s28 + $0x60] sm:$0xf] %vm928_vm3, %v1194_v47  ;;  %v1197_v56 = vpack.c.bf16 %v795_v7, %v795_v7  ;;  %v793_v33 = vmul.f32 %v1402_v11, %v1660_v57 }
 0x12c   : > { %v1406_v13 = vpop.eup %1405  ;;  %940 = vst.msk [vmem:[%s1667_s28 + $0x2c] sm:$0xf] %vm928_vm3, %v1181_v51  ;;  %v1179_v21 = vpack.c.bf16 %v777_v16, %v777_v16  ;;  %v782_v62 = vmul.f32 %v1404_v18, %v1671_v24 }
 0x12d   : > { %v1408_v14 = vpop.eup %1407  ;;  %956 = vst.msk [vmem:[%s1667_s28 + $0x6c] sm:$0xf] %vm928_vm3, %v1197_v56  ;;  %v1195_v25 = vpack.c.bf16 %v793_v33, %v793_v33  ;;  %v798_v50 = vmul.f32 %v1406_v13, %v1676_v4 }
 0x12e   : > { %v1410_v19 = vpop.eup %1409  ;;  %938 = vst.msk [vmem:[%s1667_s28 + $0x24] sm:$0xf] %vm928_vm3, %v1179_v21  ;;  %v1184_v26 = vpack.c.bf16 %v782_v62, %v782_v62  ;;  %v716_v29 = vadd.f32 1.0, %v1408_v14 }
 0x12f   : > { %v1412_v57 = vpop.eup %1411  ;;  %954 = vst.msk [vmem:[%s1667_s28 + $0x64] sm:$0xf] %vm928_vm3, %v1195_v25  ;;  %v1200_v34 = vpack.c.bf16 %v798_v50, %v798_v50  ;;  %v732_v36 = vadd.f32 1.0, %v1410_v19 }
 0x130   : > { %v1414_v20 = vpop.eup %1413  ;;  %943 = vst.msk [vmem:[%s1667_s28 + $0x38] sm:$0xf] %vm928_vm3, %v1184_v26  ;;  %1419 = vrcp.f32 %v716_v29  ;;  %v719_v24 = vadd.f32 1.0, %v1412_v57 }
 0x131   : > { %v1416_v39 = vpop.eup %1415  ;;  %959 = vst.msk [vmem:[%s1667_s28 + $0x78] sm:$0xf] %vm928_vm3, %v1200_v34  ;;  %1421 = vrcp.f32 %v732_v36  ;;  %v735_v4 = vadd.f32 1.0, %v1414_v20 }
 0x132   : > { %v1418_v37 = vpop.eup %1417  ;;  %1423 = vrcp.f32 %v719_v24  ;;  %v717_v45 = vadd.f32 1.0, %v1416_v39 }
 0x133   : > { %1425 = vrcp.f32 %v735_v4  ;;  %v733_v48 = vadd.f32 1.0, %v1418_v37 }
 0x134   : > { %1427 = vrcp.f32 %v717_v45 }
 0x135   : > { %1429 = vrcp.f32 %v733_v48 }
 0x13a   : > { %v1420_v44 = vpop.eup %1419 }
 0x13b   : > { %v1422_v22 = vpop.eup %1421  ;;  %v780_v30 = vmul.f32 %v1420_v44, %v1720_v63 }
 0x13c   : > { %v1424_v43 = vpop.eup %1423  ;;  %v796_v52 = vmul.f32 %v1422_v22, %v1724_v28 }
 0x13d   : > { %v1426_v53 = vpop.eup %1425  ;;  %v1182_v55 = vpack.c.bf16 %v780_v30, %v780_v30  ;;  %v783_v49 = vmul.f32 %v1424_v43, %v1728_v32 }
 0x13e   : > { %v1428_v58 = vpop.eup %1427  ;;  %v1198_v35 = vpack.c.bf16 %v796_v52, %v796_v52  ;;  %v799_v59 = vmul.f32 %v1426_v53, %v1732_v8 }
 0x13f   : > { %v1430_v54 = vpop.eup %1429  ;;  %941 = vst.msk [vmem:[%s1667_s28 + $0x30] sm:$0xf] %vm928_vm3, %v1182_v55  ;;  %v1185_v2 = vpack.c.bf16 %v783_v49, %v783_v49  ;;  %v781_v63 = vmul.f32 %v1428_v58, %v1737_v17 }
 0x140   : > { %957 = vst.msk [vmem:[%s1667_s28 + $0x70] sm:$0xf] %vm928_vm3, %v1198_v35  ;;  %v1201_v28 = vpack.c.bf16 %v799_v59, %v799_v59  ;;  %v797_v60 = vmul.f32 %v1430_v54, %v1742_v38 }
 0x141   : > { %944 = vst.msk [vmem:[%s1667_s28 + $0x3c] sm:$0xf] %vm928_vm3, %v1185_v2  ;;  %v1183_v61 = vpack.c.bf16 %v781_v63, %v781_v63 }
 0x142   : > { %960 = vst.msk [vmem:[%s1667_s28 + $0x7c] sm:$0xf] %vm928_vm3, %v1201_v28  ;;  %v1199_v32 = vpack.c.bf16 %v797_v60, %v797_v60 }
 0x143   : > { %942 = vst.msk [vmem:[%s1667_s28 + $0x34] sm:$0xf] %vm928_vm3, %v1183_v61 }
 0x144   : > { %958 = vst.msk [vmem:[%s1667_s28 + $0x74] sm:$0xf] %vm928_vm3, %v1199_v32 }
 0x145 PF: > { %s13_s14 = sadd.s32 1, %s1453_s14   ;;  %s1818_s12 = smov %s1449_s13 }
 0x146   : > { %p10_p5 = scmp.ge.s32.totalorder %s13_s14, 4   ;;  %s1819_s13 = smov %s1821_s15 }
 0x148   :  { %12 = sbr.rel (!%p10_p5) target bundleno = 2 (0x2), region = 68 }

</bundles_post_ra>
